<compile_context>
chip_gen: v6e
topology: v6e:2x2x1
jax: 0.10.0
libtpu: 0.0.40
codegen_flags: <defaults>
</compile_context>

<pallas_src>
import functools

import jax
import jax.numpy as jnp
from jax.experimental import pallas as pl
from jax.experimental.pallas import tpu as pltpu


def _round_up(x, m):
    return ((x + m - 1) // m) * m


def _recip(x):
    """EUP approx reciprocal + one Newton-Raphson step (~1e-7 relative error)."""
    r = pl.reciprocal(x, approx=True)
    return r * (2.0 - x * r)


def _student_t_row(norm, alpha):
    """(1 + norm/alpha) ** (-(alpha+1)/2) with cheap EUP paths for common alpha."""
    alpha = float(alpha)
    base = 1.0 + (norm if alpha == 1.0 else norm * (1.0 / alpha))  # >= 1
    exponent = -(alpha + 1.0) / 2.0
    if exponent == -1.0:                 # alpha == 1 (DEC default)
        return _recip(base)
    if exponent == -2.0:                 # alpha == 3
        r = _recip(base)
        return r * r
    if exponent == -1.5:                 # alpha == 2
        r = jax.lax.rsqrt(base)
        return r * r * r
    return jnp.exp(exponent * jnp.log(base))


def _clustering_kernel(zt_ref, ct_ref, s_ref, idx_ref, *, alpha, n_clusters):
    zt = zt_ref[...]                                   # (D, TB) f32, batch on lanes

    s_rows = []
    denom = None
    best_s = None
    best_idx = None
    for j in range(n_clusters):                        # K is small -> unrolled at trace time
        cj = ct_ref[:, j:j + 1]                        # (D, 1), resident, loop-invariant
        diff = zt - cj                                 # lane-broadcast -> (D, TB)
        d2_j = jnp.sum(diff * diff, axis=0, keepdims=True)   # sublane reduce -> (1, TB)
        norm_j = jnp.sqrt(d2_j)                        # L2 norm (matches the PyTorch module)
        s_j = _student_t_row(norm_j, alpha)            # unnormalized s_tmp row, (1, TB)
        s_rows.append(s_j)
        if j == 0:
            denom = s_j
            best_s = s_j
            best_idx = jnp.zeros_like(s_j, dtype=jnp.int32)
        else:
            denom = denom + s_j
            take = s_j > best_s                        # strict: first index wins ties (torch.argmax)
            best_s = jnp.where(take, s_j, best_s)
            best_idx = jnp.where(take, j, best_idx)

    inv_denom = _recip(denom)                          # (1, TB)
    s_all = jnp.concatenate(s_rows, axis=0) * inv_denom  # (K, TB), sublane-broadcast
    s_ref[...] = s_all.astype(s_ref.dtype)             # lane-dense store
    idx_ref[...] = best_idx                            # lane-dense store


def clustering_forward(z, centroids, alpha, *, block_b=8192, buffers=None):
    """z: (B, D) f32, centroids: (K, D) f32. Returns (s (B, K) f32, c (B,) i32)."""
    b, d = z.shape
    k, d2 = centroids.shape
    assert d == d2

    # Batch is the lane axis of every block -> pad B to a multiple of 128.  Keep tiles
    # large (per-grid-step overhead ~0.35us) but cap them so the grid has >= 2 steps
    # whenever possible, so the "parallel" batch axis can use both v7x TensorCores.
    b128 = _round_up(b, 128)
    tb = min(int(block_b), b128)
    if b128 >= 2 * 128:
        tb = min(tb, _round_up(pl.cdiv(b128, 2), 128))
    tb = max(tb, 128)
    grid_b = pl.cdiv(b128, tb)
    b_pad = grid_b * tb

    # Batch-on-lanes layout, produced once in the wrapper.  (If the producer of z can
    # emit (D, B) directly, pass it pre-transposed and this XLA relayout disappears.)
    zt = jnp.pad(z, ((0, b_pad - b), (0, 0))).T        # (D, B_pad)
    ct = centroids.T                                   # (D, K), tiny + resident in VMEM

    kernel = functools.partial(
        _clustering_kernel, alpha=float(alpha), n_clusters=int(k)
    )

    z_spec_kwargs = {}
    if buffers is not None and int(buffers) != 2:
        # Deeper pipelining for v7x's ~2x faster HBM if the trace shows exposed copies.
        z_spec_kwargs["pipeline_mode"] = pl.Buffered(int(buffers))

    s_t, idx = pl.pallas_call(
        kernel,
        out_shape=(
            jax.ShapeDtypeStruct((k, b_pad), jnp.float32),
            jax.ShapeDtypeStruct((1, b_pad), jnp.int32),
        ),
        grid=(grid_b,),
        in_specs=[
            pl.BlockSpec((d, tb), lambda i: (0, i), **z_spec_kwargs),  # zT: tiled on lanes
            pl.BlockSpec((d, k), lambda i: (0, 0)),                     # centroids: resident
        ],
        out_specs=(
            pl.BlockSpec((k, tb), lambda i: (0, i)),
            pl.BlockSpec((1, tb), lambda i: (0, i)),
        ),
        compiler_params=pltpu.CompilerParams(
            dimension_semantics=("parallel",),          # shard batch grid across TCs (v7x)
        ),
    )(zt, ct)

    return s_t.T[:b], idx[0, :b]


def clustering_forward_ref(z, centroids, alpha):
    """Pure-JAX reference replicating the PyTorch forward."""
    diff = z[:, None, :] - centroids[None, :, :]        # (B, K, D)
    norm = jnp.sqrt(jnp.sum(diff * diff, axis=-1))      # (B, K)
    s_tmp = (1.0 + norm / alpha) ** (-((alpha + 1.0) / 2.0))
    s = s_tmp / jnp.sum(s_tmp, axis=1, keepdims=True)
    c = jnp.argmax(s, axis=1).astype(jnp.int32)
    return s, c


if __name__ == "__main__":
    # Config: n_clusters=4, latent_ndim=32, alpha=1.0 (typical DEC alpha).
    n_clusters = 4
    latent_ndim = 32
    alpha = 1.0

    key = jax.random.PRNGKey(0)
    kz, kc, kz2 = jax.random.split(key, 3)
    # The module's default nn.ParameterList of zeros would make all clusters identical;
    # use random centroids so argmax is meaningful.
    centroids = jax.random.normal(kc, (n_clusters, latent_ndim), dtype=jnp.float32)

    # Small batch (single grid step, batch-padding path).
    batch = 8
    z = jax.random.normal(kz, (batch, latent_ndim), dtype=jnp.float32)
    s, c = clustering_forward(z, centroids, alpha)
    s = jax.block_until_ready(s)
    c = jax.block_until_ready(c)
    s_ref, c_ref = clustering_forward_ref(z, centroids, alpha)
    assert s.shape == (batch, n_clusters) and s.dtype == jnp.float32
    assert c.shape == (batch,) and c.dtype == jnp.int32
    assert jnp.allclose(s, s_ref, atol=1e-5, rtol=1e-5)
    assert jnp.array_equal(c, c_ref)

    # Larger batch with a small block to exercise the multi-step grid + padding path.
    batch2 = 400
    z2 = jax.random.normal(kz2, (batch2, latent_ndim), dtype=jnp.float32)
    s2, c2 = clustering_forward(z2, centroids, alpha, block_b=128)
    s2 = jax.block_until_ready(s2)
    c2 = jax.block_until_ready(c2)
    s2_ref, c2_ref = clustering_forward_ref(z2, centroids, alpha)
    assert s2.shape == (batch2, n_clusters) and c2.shape == (batch2,)
    assert jnp.allclose(s2, s2_ref, atol=1e-5, rtol=1e-5)
    assert jnp.array_equal(c2, c2_ref)

    print("KERNEL_OK")
</pallas_src>

<mosaic_0001>
module attributes {stable_mosaic.version = 11 : i64} {
  func.func @_clustering_kernel(%arg0: i32, %arg1: memref<32x128xf32, #tpu.memory_space<vmem>>, %arg2: memref<32x4xf32, #tpu.memory_space<vmem>>, %arg3: memref<4x128xf32, #tpu.memory_space<vmem>>, %arg4: memref<1x128xi32, #tpu.memory_space<vmem>>) attributes {dimension_semantics = [#tpu.dimension_semantics<parallel>], iteration_bounds = array<i64: 1>, scalar_prefetch = 0 : i64, scratch_operands = 0 : i64, tpu.core_type = #tpu.core_type<tc>, window_params = [{transform_indices = @transform_0, window_bounds = array<i64: 32, 128>}, {pipeline_mode = #tpu.pipeline_mode<synchronous>, transform_indices = @transform_1, window_bounds = array<i64: 32, 4>}, {transform_indices = @transform_2, window_bounds = array<i64: 4, 128>}, {transform_indices = @transform_3, window_bounds = array<i64: 1, 128>}]} {
    %c0 = arith.constant 0 : index
    %c0_0 = arith.constant 0 : index
    %0 = vector.load %arg1[%c0, %c0_0] : memref<32x128xf32, #tpu.memory_space<vmem>>, vector<32x128xf32>
    %c0_1 = arith.constant 0 : index
    %c0_2 = arith.constant 0 : index
    %1 = vector.load %arg2[%c0_1, %c0_2] : memref<32x4xf32, #tpu.memory_space<vmem>>, vector<32x1xf32>
    %2 = vector.broadcast %1 : vector<32x1xf32> to vector<32x128xf32>
    %3 = arith.subf %0, %2 : vector<32x128xf32>
    %4 = arith.mulf %3, %3 : vector<32x128xf32>
    %cst = arith.constant dense<0.000000e+00> : vector<128xf32>
    %5 = vector.multi_reduction <add>, %4, %cst [0] : vector<32x128xf32> to vector<128xf32>
    %6 = vector.shape_cast %5 : vector<128xf32> to vector<1x128xf32>
    %7 = math.sqrt %6 : vector<1x128xf32>
    %cst_3 = arith.constant 1.000000e+00 : f32
    %8 = vector.broadcast %cst_3 : f32 to vector<1x128xf32>
    %9 = arith.addf %8, %7 : vector<1x128xf32>
    %10 = tpu.reciprocal %9 {approx = true} : vector<1x128xf32> -> vector<1x128xf32>
    %11 = arith.mulf %9, %10 : vector<1x128xf32>
    %cst_4 = arith.constant 2.000000e+00 : f32
    %12 = vector.broadcast %cst_4 : f32 to vector<1x128xf32>
    %13 = arith.subf %12, %11 : vector<1x128xf32>
    %14 = arith.mulf %10, %13 : vector<1x128xf32>
    %c0_i32 = arith.constant 0 : i32
    %15 = vector.broadcast %c0_i32 : i32 to vector<1x128xi32>
    %c0_5 = arith.constant 0 : index
    %c1 = arith.constant 1 : index
    %16 = vector.load %arg2[%c0_5, %c1] : memref<32x4xf32, #tpu.memory_space<vmem>>, vector<32x1xf32>
    %17 = vector.broadcast %16 : vector<32x1xf32> to vector<32x128xf32>
    %18 = arith.subf %0, %17 : vector<32x128xf32>
    %19 = arith.mulf %18, %18 : vector<32x128xf32>
    %cst_6 = arith.constant dense<0.000000e+00> : vector<128xf32>
    %20 = vector.multi_reduction <add>, %19, %cst_6 [0] : vector<32x128xf32> to vector<128xf32>
    %21 = vector.shape_cast %20 : vector<128xf32> to vector<1x128xf32>
    %22 = math.sqrt %21 : vector<1x128xf32>
    %cst_7 = arith.constant 1.000000e+00 : f32
    %23 = vector.broadcast %cst_7 : f32 to vector<1x128xf32>
    %24 = arith.addf %23, %22 : vector<1x128xf32>
    %25 = tpu.reciprocal %24 {approx = true} : vector<1x128xf32> -> vector<1x128xf32>
    %26 = arith.mulf %24, %25 : vector<1x128xf32>
    %cst_8 = arith.constant 2.000000e+00 : f32
    %27 = vector.broadcast %cst_8 : f32 to vector<1x128xf32>
    %28 = arith.subf %27, %26 : vector<1x128xf32>
    %29 = arith.mulf %25, %28 : vector<1x128xf32>
    %30 = arith.addf %14, %29 : vector<1x128xf32>
    %31 = arith.cmpf ogt, %29, %14 : vector<1x128xf32>
    %32 = arith.select %31, %29, %14 : vector<1x128xi1>, vector<1x128xf32>
    %c1_i32 = arith.constant 1 : i32
    %33 = vector.broadcast %c1_i32 : i32 to vector<1x128xi32>
    %34 = arith.select %31, %33, %15 : vector<1x128xi1>, vector<1x128xi32>
    %c0_9 = arith.constant 0 : index
    %c2 = arith.constant 2 : index
    %35 = vector.load %arg2[%c0_9, %c2] : memref<32x4xf32, #tpu.memory_space<vmem>>, vector<32x1xf32>
    %36 = vector.broadcast %35 : vector<32x1xf32> to vector<32x128xf32>
    %37 = arith.subf %0, %36 : vector<32x128xf32>
    %38 = arith.mulf %37, %37 : vector<32x128xf32>
    %cst_10 = arith.constant dense<0.000000e+00> : vector<128xf32>
    %39 = vector.multi_reduction <add>, %38, %cst_10 [0] : vector<32x128xf32> to vector<128xf32>
    %40 = vector.shape_cast %39 : vector<128xf32> to vector<1x128xf32>
    %41 = math.sqrt %40 : vector<1x128xf32>
    %cst_11 = arith.constant 1.000000e+00 : f32
    %42 = vector.broadcast %cst_11 : f32 to vector<1x128xf32>
    %43 = arith.addf %42, %41 : vector<1x128xf32>
    %44 = tpu.reciprocal %43 {approx = true} : vector<1x128xf32> -> vector<1x128xf32>
    %45 = arith.mulf %43, %44 : vector<1x128xf32>
    %cst_12 = arith.constant 2.000000e+00 : f32
    %46 = vector.broadcast %cst_12 : f32 to vector<1x128xf32>
    %47 = arith.subf %46, %45 : vector<1x128xf32>
    %48 = arith.mulf %44, %47 : vector<1x128xf32>
    %49 = arith.addf %30, %48 : vector<1x128xf32>
    %50 = arith.cmpf ogt, %48, %32 : vector<1x128xf32>
    %51 = arith.select %50, %48, %32 : vector<1x128xi1>, vector<1x128xf32>
    %c2_i32 = arith.constant 2 : i32
    %52 = vector.broadcast %c2_i32 : i32 to vector<1x128xi32>
    %53 = arith.select %50, %52, %34 : vector<1x128xi1>, vector<1x128xi32>
    %c0_13 = arith.constant 0 : index
    %c3 = arith.constant 3 : index
    %54 = vector.load %arg2[%c0_13, %c3] : memref<32x4xf32, #tpu.memory_space<vmem>>, vector<32x1xf32>
    %55 = vector.broadcast %54 : vector<32x1xf32> to vector<32x128xf32>
    %56 = arith.subf %0, %55 : vector<32x128xf32>
    %57 = arith.mulf %56, %56 : vector<32x128xf32>
    %cst_14 = arith.constant dense<0.000000e+00> : vector<128xf32>
    %58 = vector.multi_reduction <add>, %57, %cst_14 [0] : vector<32x128xf32> to vector<128xf32>
    %59 = vector.shape_cast %58 : vector<128xf32> to vector<1x128xf32>
    %60 = math.sqrt %59 : vector<1x128xf32>
    %cst_15 = arith.constant 1.000000e+00 : f32
    %61 = vector.broadcast %cst_15 : f32 to vector<1x128xf32>
    %62 = arith.addf %61, %60 : vector<1x128xf32>
    %63 = tpu.reciprocal %62 {approx = true} : vector<1x128xf32> -> vector<1x128xf32>
    %64 = arith.mulf %62, %63 : vector<1x128xf32>
    %cst_16 = arith.constant 2.000000e+00 : f32
    %65 = vector.broadcast %cst_16 : f32 to vector<1x128xf32>
    %66 = arith.subf %65, %64 : vector<1x128xf32>
    %67 = arith.mulf %63, %66 : vector<1x128xf32>
    %68 = arith.addf %49, %67 : vector<1x128xf32>
    %69 = arith.cmpf ogt, %67, %51 : vector<1x128xf32>
    %c3_i32 = arith.constant 3 : i32
    %70 = vector.broadcast %c3_i32 : i32 to vector<1x128xi32>
    %71 = arith.select %69, %70, %53 : vector<1x128xi1>, vector<1x128xi32>
    %72 = tpu.reciprocal %68 {approx = true} : vector<1x128xf32> -> vector<1x128xf32>
    %73 = arith.mulf %68, %72 : vector<1x128xf32>
    %cst_17 = arith.constant 2.000000e+00 : f32
    %74 = vector.broadcast %cst_17 : f32 to vector<1x128xf32>
    %75 = arith.subf %74, %73 : vector<1x128xf32>
    %76 = arith.mulf %72, %75 : vector<1x128xf32>
    %77 = tpu.concatenate %14, %29, %48, %67 in 0 : vector<1x128xf32>, vector<1x128xf32>, vector<1x128xf32>, vector<1x128xf32> -> vector<4x128xf32>
    %78 = vector.broadcast %76 : vector<1x128xf32> to vector<4x128xf32>
    %79 = arith.mulf %77, %78 : vector<4x128xf32>
    %c0_18 = arith.constant 0 : index
    %c0_19 = arith.constant 0 : index
    %80 = vector.load %arg3[%c0_18, %c0_19] : memref<4x128xf32, #tpu.memory_space<vmem>>, vector<4x128xf32>
    tpu.vector_store %arg3[%c0_18, %c0_19], %79 {strides = array<i32>} : memref<4x128xf32, #tpu.memory_space<vmem>>, vector<4x128xf32>,
    %c0_20 = arith.constant 0 : index
    %c0_21 = arith.constant 0 : index
    %81 = vector.load %arg4[%c0_20, %c0_21] : memref<1x128xi32, #tpu.memory_space<vmem>>, vector<1x128xi32>
    tpu.vector_store %arg4[%c0_20, %c0_21], %71 {strides = array<i32>} : memref<1x128xi32, #tpu.memory_space<vmem>>, vector<1x128xi32>,
    return
  }
  func.func @transform_0(%arg0: i32) -> (i32, i32) {
    %c0_i32 = arith.constant 0 : i32
    %c0_i32_0 = arith.constant 0 : i32
    return %c0_i32, %arg0 : i32, i32
  }
  func.func @transform_1(%arg0: i32) -> (i32, i32) {
    %c0_i32 = arith.constant 0 : i32
    %c0_i32_0 = arith.constant 0 : i32
    %c0_i32_1 = arith.constant 0 : i32
    return %c0_i32, %c0_i32_0 : i32, i32
  }
  func.func @transform_2(%arg0: i32) -> (i32, i32) {
    %c0_i32 = arith.constant 0 : i32
    %c0_i32_0 = arith.constant 0 : i32
    return %c0_i32, %arg0 : i32, i32
  }
  func.func @transform_3(%arg0: i32) -> (i32, i32) {
    %c0_i32 = arith.constant 0 : i32
    %c0_i32_0 = arith.constant 0 : i32
    return %c0_i32, %arg0 : i32, i32
  }
}

</mosaic_0001>

<bundles_post_ra>
// kernel: tpu_custom_call.1
= control target key start
LH: loop header
LB: loop body
LE: loop exit
PB: predicated region body
PF: predicated region fallthrough
CT: control target
= control target key end

     0   :  { %9 = vsyncpa [#allocation3], 0  ;;  %v338_v1 = vmov 1   ;;  %v339_v2 = vmov 0   ;;  %s397_s0 = inlined_call_operand.vmem [shape: f32[32,128], index: 0, kind: input, shape index: {}]   ;;  %s398_s1 = inlined_call_operand.vmem [shape: f32[32,4], index: 1, kind: input, shape index: {}]   ;;  %s399_s2 = inlined_call_operand.hbm [shape: f32[4,128], index: 2, kind: output, shape index: {0}]   ;;  %s400_s3 = inlined_call_operand.hbm [shape: s32[1,128], index: 3, kind: output, shape index: {1}]  }
   0x1   :  { %v19_v0 = vld [vmem:[%s398_s1] sm:$0xff]  ;;  %266 = vset.pattern.permute.xlu1 %v338_v1  ;;  %265 = vset.pattern.permute.xlu0 %v339_v2 }
   0x2   :  { %73 = vperm.xlu1 %266, %v19_v0   ;;  %25 = vperm.xlu0 %265, %v19_v0  }
   0x3   :  { %10 = vsyncpa [#allocation5], 0  ;;  %v20_v3 = vld [vmem:[%s398_s1 + $0x8] sm:$0xff]  ;;  %v21_v4 = vld [vmem:[%s398_s1 + $0x10] sm:$0xff]  ;;  %v340_v5 = vmov 2   ;;  %v341_v7 = vmov 3  }
   0x4   :  { %v22_v6 = vld [vmem:[%s398_s1 + $0x18] sm:$0xff]  ;;  %v15_v12 = vld [vmem:[%s397_s0] sm:$0xff]  ;;  %v16_v13 = vld [vmem:[%s397_s0 + $0x8] sm:$0xff] }
   0x5   :  { %v17_v18 = vld [vmem:[%s397_s0 + $0x10] sm:$0xff]  ;;  %v18_v28 = vld [vmem:[%s397_s0 + $0x18] sm:$0xff]  ;;  %s342_s0 = smov [#allocation4]  }
   0x6   :  { %77 = vperm.xlu1 %266, %v20_v3   ;;  %30 = vperm.xlu0 %265, %v20_v3   ;;  %s247_s27 = sshll.u32 %s342_s0, 4  ;;  %s248_s27 = int_to_ptr.vmem [resolvable:$true] %s247_s27 }
   0x7   :  { %s294_s28 = scalar_lea.vmem %s248_s27, 16  ;;  %s298_s29 = scalar_lea.vmem %s248_s27, 32 }
   0x8   :  { %p295_p0 = scmp.ne.s32.totalorder %s248_s27, %s294_s28  ;;  %p299_p1 = scmp.lt.s32.totalorder %s248_s27, %s248_s27 }
   0x9   :  { %p300_p2 = scmp.lt.s32.totalorder %s298_s29, %s294_s28 }
   0xa   :  { %81 = vperm.xlu1 %266, %v21_v4   ;;  %35 = vperm.xlu0 %265, %v21_v4  }
   0xb   :  { %p301_p3 = por %p300_p2, %p299_p1 }
   0xd   :  { %p302_p4 = pnand %p301_p3, %p295_p0 }
   0xe   :  { %268 = vset.pattern.permute.xlu1 %v340_v5  ;;  %267 = vset.pattern.permute.xlu0 %v340_v5 }
   0xf   :  { %126 = vperm.xlu1 %268, %v20_v3   ;;  %122 = vperm.xlu0 %267, %v19_v0  }
  0x13   :  { %269 = vset.pattern.permute.xlu1 %v339_v2  ;;  %270 = vset.pattern.permute.xlu0 %v338_v1 }
  0x14   :  { %40 = vperm.xlu1 %269, %v22_v6   ;;  %85 = vperm.xlu0 %270, %v22_v6  }
  0x18   :  { %271 = vset.pattern.permute.xlu1 %v340_v5  ;;  %273 = vset.pattern.permute.xlu0 %v341_v7 }
  0x19   :  { %130 = vperm.xlu1 %271, %v21_v4   ;;  %175 = vperm.xlu0 %273, %v20_v3  }
  0x1d   :  { %272 = vset.pattern.permute.xlu1 %v341_v7  ;;  %183 = vperm.xlu0 %273, %v22_v6  }
  0x1e   :  { %171 = vperm.xlu1 %272, %v19_v0  }
  0x22   :  { %274 = vset.pattern.permute.xlu1 %v340_v5 }
  0x23   :  { %134 = vperm.xlu1 %274, %v22_v6  }
  0x27   :  { %275 = vset.pattern.permute.xlu1 %v341_v7 }
  0x28   :  { %179 = vperm.xlu1 %275, %v21_v4  }
  0x7d   :  { %v74_v8 = vpop.permute.xlu1 %73  ;;  %v26_v9 = vpop.permute.xlu0 %25 }
  0x7e   :  { %v43_v16 = vsub.f32 %v15_v12, %v26_v9  ;;  %v88_v20 = vsub.f32 %v15_v12, %v74_v8 }
  0x80   :  { %v47_v21 = vmul.f32 %v43_v16, %v43_v16  ;;  %v92_v29 = vmul.f32 %v88_v20, %v88_v20 }
  0x81   :  { %v78_v10 = vpop.permute.xlu1 %77  ;;  %v31_v11 = vpop.permute.xlu0 %30 }
  0x82   :  { %v44_v17 = vsub.f32 %v16_v13, %v31_v11  ;;  %v89_v19 = vsub.f32 %v16_v13, %v78_v10 }
  0x84   :  { %v48_v22 = vmul.f32 %v44_v17, %v44_v17  ;;  %v93_v27 = vmul.f32 %v89_v19, %v89_v19 }
  0x85   :  { %v82_v14 = vpop.permute.xlu1 %81  ;;  %v36_v15 = vpop.permute.xlu0 %35 }
  0x86   :  { %v90_v23 = vsub.f32 %v17_v18, %v82_v14  ;;  %v45_v24 = vsub.f32 %v17_v18, %v36_v15  ;;  %v51_v30 = vadd.f32 %v48_v22, %v47_v21  ;;  %v96_v35 = vadd.f32 %v93_v27, %v92_v29 }
  0x88   :  { %v94_v31 = vmul.f32 %v90_v23, %v90_v23  ;;  %v49_v32 = vmul.f32 %v45_v24, %v45_v24 }
  0x8a   :  { %v127_v25 = vpop.permute.xlu1 %126  ;;  %v123_v26 = vpop.permute.xlu0 %122  ;;  %v97_v38 = vadd.f32 %v96_v35, %v94_v31  ;;  %v52_v39 = vadd.f32 %v51_v30, %v49_v32 }
  0x8b   :  { %v138_v47 = vsub.f32 %v16_v13, %v127_v25  ;;  %v137_v48 = vsub.f32 %v15_v12, %v123_v26 }
  0x8d   :  { %v142_v55 = vmul.f32 %v138_v47, %v138_v47  ;;  %v141_v56 = vmul.f32 %v137_v48, %v137_v48 }
  0x8f   :  { %v41_v33 = vpop.permute.xlu1 %40  ;;  %v86_v34 = vpop.permute.xlu0 %85  ;;  %v145_v3 = vadd.f32 %v142_v55, %v141_v56 }
  0x90   :  { %v46_v36 = vsub.f32 %v18_v28, %v41_v33  ;;  %v91_v37 = vsub.f32 %v18_v28, %v86_v34 }
  0x92   :  { %v50_v40 = vmul.f32 %v46_v36, %v46_v36  ;;  %v95_v41 = vmul.f32 %v91_v37, %v91_v37 }
  0x94   :  { %v53_v42 = vadd.f32 %v52_v39, %v50_v40  ;;  %v98_v43 = vadd.f32 %v97_v38, %v95_v41  ;;  %v131_v44 = vpop.permute.xlu1 %130  ;;  %v176_v57 = vpop.permute.xlu0 %175 }
  0x95   :  { %v139_v51 = vsub.f32 %v17_v18, %v131_v44  ;;  %v187_v0 = vsub.f32 %v16_v13, %v176_v57 }
  0x96   :  { %v54_v45 = vrot.slane %v53_v42, 4  ;;  %v99_v46 = vrot.slane %v98_v43, 4 }
  0x97   :  { %v143_v60 = vmul.f32 %v139_v51, %v139_v51  ;;  %v191_v11 = vmul.f32 %v187_v0, %v187_v0 }
  0x98   :  { %v55_v49 = vadd.f32 %v54_v45, %v53_v42  ;;  %v100_v50 = vadd.f32 %v99_v46, %v98_v43  ;;  %v184_v9 = vpop.permute.xlu0 %183 }
  0x99   :  { %v172_v52 = vpop.permute.xlu1 %171  ;;  %v146_v7 = vadd.f32 %v145_v3, %v143_v60  ;;  %v189_v16 = vsub.f32 %v18_v28, %v184_v9 }
  0x9a   :  { %v56_v53 = vrot.slane %v55_v49, 2  ;;  %v101_v54 = vrot.slane %v100_v50, 2  ;;  %v186_v63 = vsub.f32 %v15_v12, %v172_v52 }
  0x9b   :  { %v193_v21 = vmul.f32 %v189_v16, %v189_v16 }
  0x9c   :  { %v57_v58 = vadd.f32 %v56_v53, %v55_v49  ;;  %v102_v59 = vadd.f32 %v101_v54, %v100_v50  ;;  %v190_v10 = vmul.f32 %v186_v63, %v186_v63 }
  0x9e   :  { %v58_v61 = vrot.slane %v57_v58, 1  ;;  %v103_v62 = vrot.slane %v102_v59, 1  ;;  %v135_v1 = vpop.permute.xlu1 %134  ;;  %v194_v20 = vadd.f32 %v191_v11, %v190_v10 }
  0x9f   :  { %v140_v4 = vsub.f32 %v18_v28, %v135_v1 }
  0xa0   :  { %v59_v5 = vadd.f32 %v58_v61, %v57_v58  ;;  %v104_v6 = vadd.f32 %v103_v62, %v102_v59 }
  0xa1   :  { %v144_v8 = vmul.f32 %v140_v4, %v140_v4 }
  0xa2   :  { %276 = vrsqrt.f32 %v59_v5  ;;  %vm62_vm0 = vcmp.eq.f32.partialorder %v59_v5, inf  ;;  %v65_v36 = vand.u32 2147483648, %v59_v5  ;;  %vm107_vm1 = vcmp.eq.f32.partialorder %v104_v6, inf }
  0xa3   :  { %278 = vrsqrt.f32 %v104_v6  ;;  %v147_v14 = vadd.f32 %v146_v7, %v144_v8  ;;  %v180_v15 = vpop.permute.xlu1 %179  ;;  %vm64_vm2 = vcmp.eq.f32.partialorder %v59_v5, 0.0  ;;  %v110_v38 = vand.u32 2147483648, %v104_v6 }
  0xa4   :  { %v188_v17 = vsub.f32 %v17_v18, %v180_v15  ;;  %vm109_vm3 = vcmp.eq.f32.partialorder %v104_v6, 0.0 }
  0xa5   :  { %v148_v19 = vrot.slane %v147_v14, 4 }
  0xa6   :  { %v192_v12 = vmul.f32 %v188_v17, %v188_v17 }
  0xa7   :  { %v149_v13 = vadd.f32 %v148_v19, %v147_v14 }
  0xa8   :  { %v195_v22 = vadd.f32 %v194_v20, %v192_v12 }
  0xa9   :  { %v150_v23 = vrot.slane %v149_v13, 2 }
  0xaa   :  { %v196_v24 = vadd.f32 %v195_v22, %v193_v21 }
  0xab   :  { %v151_v25 = vadd.f32 %v150_v23, %v149_v13 }
  0xac   :  { %v197_v26 = vrot.slane %v196_v24, 4 }
  0xad   :  { %v152_v27 = vrot.slane %v151_v25, 1 }
  0xae   :  { %v198_v29 = vadd.f32 %v197_v26, %v196_v24 }
  0xaf   :  { %v277_v30 = vpop.eup %276  ;;  %v153_v31 = vadd.f32 %v152_v27, %v151_v25 }
  0xb0   :  { %v279_v32 = vpop.eup %278  ;;  %v199_v33 = vrot.slane %v198_v29, 2  ;;  %v61_v34 = vmul.f32 %v277_v30, %v59_v5 }
  0xb1   :  { %280 = vrsqrt.f32 %v153_v31  ;;  %v106_v18 = vmul.f32 %v279_v32, %v104_v6  ;;  %vm156_vm4 = vcmp.eq.f32.partialorder %v153_v31, inf  ;;  %v159_v47 = vand.u32 2147483648, %v153_v31 }
  0xb2   :  { %v200_v28 = vadd.f32 %v199_v33, %v198_v29  ;;  %v63_v35 = vsel %vm62_vm0, %v59_v5, %v61_v34  ;;  %vm158_vm5 = vcmp.eq.f32.partialorder %v153_v31, 0.0 }
  0xb3   :  { %v108_v37 = vsel %vm107_vm1, %v104_v6, %v106_v18  ;;  %v66_v40 = vsel %vm64_vm2, %v65_v36, %v63_v35 }
  0xb4   :  { %v201_v39 = vrot.slane %v200_v28, 1  ;;  %v111_v41 = vsel %vm109_vm3, %v110_v38, %v108_v37  ;;  %v67_v43 = vadd.f32 1.0, %v66_v40 }
  0xb5   :  { %v112_v44 = vadd.f32 1.0, %v111_v41 }
  0xb6   :  { %v202_v42 = vadd.f32 %v201_v39, %v200_v28 }
  0xb8   :  { %282 = vrsqrt.f32 %v202_v42  ;;  %vm205_vm6 = vcmp.eq.f32.partialorder %v202_v42, inf  ;;  %v208_v53 = vand.u32 2147483648, %v202_v42  ;;  %vm207_vm7 = vcmp.eq.f32.partialorder %v202_v42, 0.0 }
  0xb9   :  { %284 = vrcp.f32 %v67_v43 }
  0xba   :  { %286 = vrcp.f32 %v112_v44 }
  0xbe   :  { %v281_v45 = vpop.eup %280 }
  0xbf   :  { %v155_v46 = vmul.f32 %v281_v45, %v153_v31 }
  0xc1   :  { %v157_v48 = vsel %vm156_vm4, %v153_v31, %v155_v46 }
  0xc2   :  { %v160_v49 = vsel %vm158_vm5, %v159_v47, %v157_v48 }
  0xc3   :  { %v161_v50 = vadd.f32 1.0, %v160_v49 }
  0xc5   :  { %v283_v51 = vpop.eup %282  ;;  %288 = vrcp.f32 %v161_v50 }
  0xc6   :  { %v204_v52 = vmul.f32 %v283_v51, %v202_v42  ;;  %v285_v54 = vpop.eup %284 }
  0xc7   :  { %v287_v56 = vpop.eup %286  ;;  %v69_v59 = vmul.f32 %v285_v54, %v67_v43 }
  0xc8   :  { %v206_v55 = vsel %vm205_vm6, %v202_v42, %v204_v52  ;;  %v114_v60 = vmul.f32 %v287_v56, %v112_v44 }
  0xc9   :  { %v209_v57 = vsel %vm207_vm7, %v208_v53, %v206_v55  ;;  %v70_v61 = vsub.f32 2.0, %v69_v59 }
  0xca   :  { %v210_v58 = vadd.f32 1.0, %v209_v57  ;;  %v115_v62 = vsub.f32 2.0, %v114_v60 }
  0xcb   :  { %v71_v1 = vmul.f32 %v285_v54, %v70_v61 }
  0xcc   :  { %290 = vrcp.f32 %v210_v58  ;;  %v116_v3 = vmul.f32 %v287_v56, %v115_v62 }
  0xce   :  { %vm118_vm8 = vcmp.gt.f32.partialorder %v116_v3, %v71_v1  ;;  %v117_v9 = vadd.f32 %v116_v3, %v71_v1 }
  0xcf   :  { %v119_v8 = vsel %vm118_vm8, %v116_v3, %v71_v1  ;;  %v120_v15 = vsel %vm118_vm8, 1, %v339_v2 }
  0xd2   :  { %v289_v63 = vpop.eup %288 }
  0xd3   :  { %v163_v0 = vmul.f32 %v289_v63, %v161_v50 }
  0xd5   :  { %v164_v4 = vsub.f32 2.0, %v163_v0 }
  0xd7   :  { %v165_v5 = vmul.f32 %v289_v63, %v164_v4 }
  0xd9   :  { %v291_v6 = vpop.eup %290  ;;  %vm167_vm9 = vcmp.gt.f32.partialorder %v165_v5, %v119_v8  ;;  %v166_v11 = vadd.f32 %v165_v5, %v117_v9 }
  0xda   :  { %v212_v7 = vmul.f32 %v291_v6, %v210_v58  ;;  %v168_v16 = vsel %vm167_vm9, %v165_v5, %v119_v8  ;;  %v169_v19 = vsel %vm167_vm9, 2, %v120_v15 }
  0xdc   :  { %v213_v10 = vsub.f32 2.0, %v212_v7 }
  0xde   :  { %v214_v14 = vmul.f32 %v291_v6, %v213_v10 }
  0xe0   :  { %v215_v17 = vadd.f32 %v214_v14, %v166_v11  ;;  %vm216_vm10 = vcmp.gt.f32.partialorder %v214_v14, %v168_v16 }
  0xe1   :  { %v217_v20 = vsel %vm216_vm10, 3, %v169_v19 }
  0xe2   :  { %292 = vrcp.f32 %v215_v17  ;;  %230 = vst [vmem:[#allocation4] sm:$0x1] %v217_v20 }
  0xe3   :  { %305 = shalt.err (!%p302_p4)
}
  0xe4   :  { %250 = dma.vmem_to_hbm [thread:$0]  %s248_s27, 16, %s400_s3, [#allocation5]   ;;  %vm222_vm11 = vcmask 1040384   ;;  %vm224_vm12 = vcmask 1041408   ;;  %vm226_vm13 = vcmask 1042432  }
  0xe5   :  { %v223_v21 = vsel %vm222_vm11, %v71_v1, %v116_v3  ;;  %s343_s5 = smov [#allocation2]  }
  0xe6   :  { %s237_s6 = sshll.u32 %s343_s5, 4  ;;  %v225_v23 = vsel %vm224_vm12, %v223_v21, %v165_v5  ;;  %s238_s6 = int_to_ptr.vmem [resolvable:$true] %s237_s6 }
  0xe7   :  { %v227_v24 = vsel %vm226_vm13, %v225_v23, %v214_v14  ;;  %s314_s7 = scalar_lea.vmem %s238_s6, 64  ;;  %p319_p6 = scmp.lt.s32.totalorder %s238_s6, %s238_s6 }
  0xe8   :  { %p315_p5 = scmp.ne.s32.totalorder %s238_s6, %s314_s7  ;;  %p320_p7 = scmp.lt.s32.totalorder %s314_s7, %s314_s7 }
  0xea   :  { %p321_p8 = por %p320_p7, %p319_p6 }
  0xec   :  { %p322_p9 = pnand %p321_p8, %p315_p5 }
  0xef   :  { %v293_v2 = vpop.eup %292 }
  0xf0   :  { %v219_v12 = vmul.f32 %v293_v2, %v215_v17 }
  0xf2   :  { %v220_v13 = vsub.f32 2.0, %v219_v12 }
  0xf4   :  { %v221_v22 = vmul.f32 %v293_v2, %v220_v13 }
  0xf6   :  { %v228_v25 = vmul.f32 %v227_v24, %v221_v22 }
  0xf8   :  { %229 = vst [vmem:[#allocation2] sm:$0xf] %v228_v25 }
  0xf9   :  { %325 = shalt.err (!%p322_p9)
}
  0xfa   :  { %240 = dma.vmem_to_hbm [thread:$0]  %s238_s6, 64, %s399_s2, [#allocation3]  }
  0xfb   :  { %334 = dma.done.wait [#allocation3], 64  }
  0xfc   :  { %335 = vsyncadd [#allocation3], 4294967232 }
  0xfd   :  { %336 = dma.done.wait [#allocation5], 16  }
  0xfe   :  { %337 = vsyncadd [#allocation5], 4294967280 }
  0xff   :  { %257 = vsyncpa [#allocation3], 1 }
 0x100   :  { %258 = vsyncpa [#allocation5], 1 }

</bundles_post_ra>
